<compile_context>
chip_gen: v7x
topology: tpu7x:2x2x1
jax: 0.10.0
libtpu: 0.0.40
codegen_flags: <defaults>
</compile_context>

<pallas_src>
import functools

import jax
import jax.numpy as jnp
from jax.experimental import pallas as pl
from jax.experimental.pallas import tpu as pltpu

_LANES = 128
_SUBLANES = 8


def _round_up(n, m):
    return ((n + m - 1) // m) * m


def _mlp_softmax_kernel(x_ref, w1_ref, b1_ref, w2_ref, b2_ref, o_ref):
    # linear1: (TB, in) @ (in, hidden) + (1, hidden), then ReLU
    h = jnp.dot(x_ref[...], w1_ref[...], preferred_element_type=jnp.float32)
    h = jnp.maximum(h + b1_ref[...], 0.0)
    # linear2: (TB, hidden) @ (hidden, out_padded) + (1, out_padded)
    # Padded lanes get bias -1e30 -> exp() underflows to 0 in the softmax.
    logits = jnp.dot(h, w2_ref[...], preferred_element_type=jnp.float32)
    logits = logits + b2_ref[...]
    # Numerically stable softmax over the lane axis (dim=1 of the logits).
    m = jnp.max(logits, axis=-1, keepdims=True)
    e = jnp.exp(logits - m)
    denom = jnp.sum(e, axis=-1, keepdims=True)
    inv = pl.reciprocal(denom, approx=True)  # EUP slot; frees the VPU divide
    o_ref[...] = (e * inv).astype(o_ref.dtype)


@functools.partial(jax.jit, static_argnames=("tb",))
def sentiment_forward(x, w1, b1, w2, b2, *, tb=None):
    """x: (B, input_dim); w1: (input_dim, hidden); b1: (hidden,);
    w2: (hidden, output_dim); b2: (output_dim,). Returns (B, output_dim) f32."""
    B, in_dim = x.shape
    hidden = w1.shape[1]
    out_dim = w2.shape[1]

    # Batch tile: big tiles amortize per-step overhead; multiple of 8 sublanes.
    if tb is None:
        tb = 512 if B >= 512 else max(_SUBLANES, _round_up(B, _SUBLANES))
    b_pad = _round_up(B, tb)
    if b_pad != B:
        x = jnp.pad(x, ((0, b_pad - B), (0, 0)))

    # Pad the output dimension to a full 128-lane tile for unmasked stores.
    out_pad = _round_up(max(out_dim, _LANES), _LANES)
    w2p = jnp.pad(w2, ((0, 0), (0, out_pad - out_dim)))
    b2p = jnp.pad(b2.reshape(1, out_dim),
                  ((0, 0), (0, out_pad - out_dim)),
                  constant_values=-1e30)
    b1_2d = b1.reshape(1, hidden)

    x = x.astype(jnp.float32)
    n_steps = b_pad // tb

    cost = pl.CostEstimate(
        flops=2 * b_pad * (in_dim * hidden + hidden * out_pad),
        transcendentals=b_pad * out_pad,
        bytes_accessed=(x.size + w1.size + b1_2d.size + w2p.size + b2p.size
                        + b_pad * out_pad) * 4,
    )

    out = pl.pallas_call(
        _mlp_softmax_kernel,
        out_shape=jax.ShapeDtypeStruct((b_pad, out_pad), jnp.float32),
        grid=(n_steps,),
        in_specs=[
            pl.BlockSpec((tb, in_dim), lambda i: (i, 0)),      # x: tiled on batch
            pl.BlockSpec((in_dim, hidden), lambda i: (0, 0)),  # w1: resident
            pl.BlockSpec((1, hidden), lambda i: (0, 0)),       # b1: resident
            pl.BlockSpec((hidden, out_pad), lambda i: (0, 0)), # w2: resident
            pl.BlockSpec((1, out_pad), lambda i: (0, 0)),      # b2: resident
        ],
        out_specs=pl.BlockSpec((tb, out_pad), lambda i: (i, 0)),
        compiler_params=pltpu.CompilerParams(
            dimension_semantics=("parallel",),  # shards batch over TCs on v7x
        ),
        cost_estimate=cost,
    )(x, w1.astype(jnp.float32), b1_2d.astype(jnp.float32),
      w2p.astype(jnp.float32), b2p.astype(jnp.float32))

    return out[:B, :out_dim]


if __name__ == "__main__":
    # Small shapes consistent with the module's forward:
    #   input_dim=32, hidden_dim=64, output_dim=4, batch=8
    batch, input_dim, hidden_dim, output_dim = 8, 32, 64, 4

    key = jax.random.PRNGKey(0)
    kx, kw1, kb1, kw2, kb2 = jax.random.split(key, 5)

    x = jax.random.normal(kx, (batch, input_dim), dtype=jnp.float32)
    # PyTorch stores W as (out, in); we generate directly in the (in, out)
    # layout used by the kernel (equivalent to passing W.T).
    w1 = jax.random.normal(kw1, (input_dim, hidden_dim), dtype=jnp.float32) * 0.1
    b1 = jax.random.normal(kb1, (hidden_dim,), dtype=jnp.float32) * 0.1
    w2 = jax.random.normal(kw2, (hidden_dim, output_dim), dtype=jnp.float32) * 0.1
    b2 = jax.random.normal(kb2, (output_dim,), dtype=jnp.float32) * 0.1

    out = sentiment_forward(x, w1, b1, w2, b2)
    out = jax.block_until_ready(out)

    # Reference check in plain JAX (same math).
    h_ref = jnp.maximum(x @ w1 + b1, 0.0)
    logits_ref = h_ref @ w2 + b2
    ref = jax.nn.softmax(logits_ref, axis=1)
    assert out.shape == (batch, output_dim)
    # Slightly relaxed tolerance: softmax denominator uses the EUP approx
    # reciprocal (relative error ~2^-12).
    assert jnp.allclose(out, ref, atol=2e-3, rtol=2e-3)

    print("KERNEL_OK")
</pallas_src>

<mosaic_0001>
module attributes {stable_mosaic.version = 11 : i64} {
  func.func @_mlp_softmax_kernel(%arg0: i32, %arg1: memref<8x32xf32, #tpu.memory_space<vmem>>, %arg2: memref<32x64xf32, #tpu.memory_space<vmem>>, %arg3: memref<1x64xf32, #tpu.memory_space<vmem>>, %arg4: memref<64x128xf32, #tpu.memory_space<vmem>>, %arg5: memref<1x128xf32, #tpu.memory_space<vmem>>, %arg6: memref<8x128xf32, #tpu.memory_space<vmem>>) attributes {dimension_semantics = [#tpu.dimension_semantics<parallel>], iteration_bounds = array<i64: 1>, scalar_prefetch = 0 : i64, scratch_operands = 0 : i64, tpu.core_type = #tpu.core_type<tc>, window_params = [{transform_indices = @transform_0, window_bounds = array<i64: 8, 32>}, {pipeline_mode = #tpu.pipeline_mode<synchronous>, transform_indices = @transform_1, window_bounds = array<i64: 32, 64>}, {pipeline_mode = #tpu.pipeline_mode<synchronous>, transform_indices = @transform_2, window_bounds = array<i64: 1, 64>}, {pipeline_mode = #tpu.pipeline_mode<synchronous>, transform_indices = @transform_3, window_bounds = array<i64: 64, 128>}, {pipeline_mode = #tpu.pipeline_mode<synchronous>, transform_indices = @transform_4, window_bounds = array<i64: 1, 128>}, {transform_indices = @transform_5, window_bounds = array<i64: 8, 128>}]} {
    %c0 = arith.constant 0 : index
    %c0_0 = arith.constant 0 : index
    %0 = vector.load %arg1[%c0, %c0_0] : memref<8x32xf32, #tpu.memory_space<vmem>>, vector<8x32xf32>
    %c0_1 = arith.constant 0 : index
    %c0_2 = arith.constant 0 : index
    %1 = vector.load %arg2[%c0_1, %c0_2] : memref<32x64xf32, #tpu.memory_space<vmem>>, vector<32x64xf32>
    %cst = arith.constant dense<0.000000e+00> : vector<8x64xf32>
    %2 = tpu.matmul %0, %1, %cst {dimension_numbers = #tpu.dot_dimension_numbers<[1], [0], [0], [1], [0, 0, 1, 1], [], []>} : vector<8x32xf32>, vector<32x64xf32>, vector<8x64xf32> -> vector<8x64xf32>
    %c0_3 = arith.constant 0 : index
    %c0_4 = arith.constant 0 : index
    %3 = vector.load %arg3[%c0_3, %c0_4] : memref<1x64xf32, #tpu.memory_space<vmem>>, vector<1x64xf32>
    %4 = vector.broadcast %3 : vector<1x64xf32> to vector<8x64xf32>
    %5 = arith.addf %2, %4 : vector<8x64xf32>
    %cst_5 = arith.constant 0.000000e+00 : f32
    %6 = vector.broadcast %cst_5 : f32 to vector<8x64xf32>
    %7 = arith.maximumf %5, %6 : vector<8x64xf32>
    %c0_6 = arith.constant 0 : index
    %c0_7 = arith.constant 0 : index
    %8 = vector.load %arg4[%c0_6, %c0_7] : memref<64x128xf32, #tpu.memory_space<vmem>>, vector<64x128xf32>
    %cst_8 = arith.constant dense<0.000000e+00> : vector<8x128xf32>
    %9 = tpu.matmul %7, %8, %cst_8 {dimension_numbers = #tpu.dot_dimension_numbers<[1], [0], [0], [1], [0, 0, 1, 1], [], []>} : vector<8x64xf32>, vector<64x128xf32>, vector<8x128xf32> -> vector<8x128xf32>
    %c0_9 = arith.constant 0 : index
    %c0_10 = arith.constant 0 : index
    %10 = vector.load %arg5[%c0_9, %c0_10] : memref<1x128xf32, #tpu.memory_space<vmem>>, vector<1x128xf32>
    %11 = vector.broadcast %10 : vector<1x128xf32> to vector<8x128xf32>
    %12 = arith.addf %9, %11 : vector<8x128xf32>
    %cst_11 = arith.constant dense<0xFF800000> : vector<8xf32>
    %13 = vector.multi_reduction <maximumf>, %12, %cst_11 [1] : vector<8x128xf32> to vector<8xf32>
    %14 = vector.shape_cast %13 : vector<8xf32> to vector<8x1xf32>
    %15 = vector.broadcast %14 : vector<8x1xf32> to vector<8x128xf32>
    %16 = arith.subf %12, %15 : vector<8x128xf32>
    %17 = math.exp %16 : vector<8x128xf32>
    %cst_12 = arith.constant dense<0.000000e+00> : vector<8xf32>
    %18 = vector.multi_reduction <add>, %17, %cst_12 [1] : vector<8x128xf32> to vector<8xf32>
    %19 = vector.shape_cast %18 : vector<8xf32> to vector<8x1xf32>
    %20 = tpu.reciprocal %19 {approx = true} : vector<8x1xf32> -> vector<8x1xf32>
    %21 = vector.broadcast %20 : vector<8x1xf32> to vector<8x128xf32>
    %22 = arith.mulf %17, %21 : vector<8x128xf32>
    %c0_13 = arith.constant 0 : index
    %c0_14 = arith.constant 0 : index
    %23 = vector.load %arg6[%c0_13, %c0_14] : memref<8x128xf32, #tpu.memory_space<vmem>>, vector<8x128xf32>
    tpu.vector_store %arg6[%c0_13, %c0_14], %22 {strides = array<i32>} : memref<8x128xf32, #tpu.memory_space<vmem>>, vector<8x128xf32>,
    return
  }
  func.func @transform_0(%arg0: i32) -> (i32, i32) {
    %c0_i32 = arith.constant 0 : i32
    %c0_i32_0 = arith.constant 0 : i32
    return %arg0, %c0_i32 : i32, i32
  }
  func.func @transform_1(%arg0: i32) -> (i32, i32) {
    %c0_i32 = arith.constant 0 : i32
    %c0_i32_0 = arith.constant 0 : i32
    %c0_i32_1 = arith.constant 0 : i32
    return %c0_i32, %c0_i32_0 : i32, i32
  }
  func.func @transform_2(%arg0: i32) -> (i32, i32) {
    %c0_i32 = arith.constant 0 : i32
    %c0_i32_0 = arith.constant 0 : i32
    %c0_i32_1 = arith.constant 0 : i32
    return %c0_i32, %c0_i32_0 : i32, i32
  }
  func.func @transform_3(%arg0: i32) -> (i32, i32) {
    %c0_i32 = arith.constant 0 : i32
    %c0_i32_0 = arith.constant 0 : i32
    %c0_i32_1 = arith.constant 0 : i32
    return %c0_i32, %c0_i32_0 : i32, i32
  }
  func.func @transform_4(%arg0: i32) -> (i32, i32) {
    %c0_i32 = arith.constant 0 : i32
    %c0_i32_0 = arith.constant 0 : i32
    %c0_i32_1 = arith.constant 0 : i32
    return %c0_i32, %c0_i32_0 : i32, i32
  }
  func.func @transform_5(%arg0: i32) -> (i32, i32) {
    %c0_i32 = arith.constant 0 : i32
    %c0_i32_0 = arith.constant 0 : i32
    return %arg0, %c0_i32 : i32, i32
  }
}

</mosaic_0001>

<bundles_post_ra>
// kernel: sentiment_forward.1
= control target key start
LH: loop header
LB: loop body
LE: loop exit
PB: predicated region body
PF: predicated region fallthrough
CT: control target
= control target key end

     0   :  { %v283_v0 = vmov 0.0|0.0   ;;  %vm284_vm0 = vmmov 0   ;;  %v285_v4 = vmov 0.0   ;;  %vm32_vm1 = vcmask 261120   ;;  %s364_s1 = inlined_call_operand.vmem [shape: f32[32,64], index: 1, kind: input, shape index: {}]   ;;  %s365_s3 = inlined_call_operand.vmem [shape: f32[64,128], index: 3, kind: input, shape index: {}]   ;;  %s366_s0 = inlined_call_operand.vmem [shape: f32[8,32], index: 0, kind: input, shape index: {}]   ;;  %s367_s2 = inlined_call_operand.vmem [shape: f32[1,64], index: 2, kind: input, shape index: {}]   ;;  %s368_s4 = inlined_call_operand.vmem [shape: f32[1,128], index: 4, kind: input, shape index: {}]   ;;  %s369_s5 = inlined_call_operand.vmem [shape: f32[8,128], index: 5, kind: output, shape index: {}]  }
   0x1   :  { %258 = vmatprep.subr.bf16.mxu0 %v283_v0  ;;  %v21_v1 = vld [vmem:[%s364_s1] sm:$0xff]  ;;  %v22_v2 = vld [vmem:[%s364_s1 + $0x8] sm:$0xff]  ;;  %v23_v3 = vld [vmem:[%s364_s1 + $0x10] sm:$0xff]  ;;  %236 = vmatprep.mubr.msk.f32.mxu0 %vm284_vm0, %v285_v4  ;;  %vm122_vm2 = vcmask 523264  }
   0x2   :  { %v259_v5 = vpack.c.bf16 %v22_v2, %v21_v1  ;;  %v24_v6 = vld [vmem:[%s364_s1 + $0x18] sm:$0xff]  ;;  %264 = vmatprep.subr.bf16.mxu1 %v283_v0  ;;  %v107_v7 = vld [vmem:[%s365_s3] sm:$0xff]  ;;  %255 = vmatprep.mubr.msk.f32.mxu1 %vm284_vm0, %v285_v4  ;;  %v108_v8 = vld [vmem:[%s365_s3 + $0x8] sm:$0xff] }
   0x3   :  { %v109_v9 = vld [vmem:[%s365_s3 + $0x10] sm:$0xff]  ;;  %v110_v10 = vld [vmem:[%s365_s3 + $0x18] sm:$0xff]  ;;  %v262_v11 = vpack.c.bf16 %v24_v6, %v23_v3  ;;  %v265_v12 = vpack.c.bf16 %v108_v8, %v107_v7  ;;  %v111_v14 = vld [vmem:[%s365_s3 + $0x20] sm:$0xff] }
   0x4   :  { %260 = vmatpush3.bf16.msra.mxu0 %v259_v5  ;;  %v268_v13 = vpack.c.bf16 %v110_v10, %v109_v9  ;;  %v112_v15 = vld [vmem:[%s365_s3 + $0x28] sm:$0xff]  ;;  %v20_v16 = vld [vmem:[%s366_s0] sm:$0xff]  ;;  %v113_v18 = vld [vmem:[%s365_s3 + $0x30] sm:$0xff] }
   0x5   :  { %261 = vmatprep.subr.bf16.mxu0 %v283_v0  ;;  %266 = vmatpush3.bf16.msra.mxu1 %v265_v12  ;;  %v271_v17 = vpack.c.bf16 %v112_v15, %v111_v14  ;;  %v114_v19 = vld [vmem:[%s365_s3 + $0x38] sm:$0xff]  ;;  %v210_v21 = vld [vmem:[%s367_s2] ss:$0 sm:$0xff] }
   0x6   :  { %267 = vmatprep.subr.bf16.mxu1 %v283_v0  ;;  %v274_v20 = vpack.c.bf16 %v114_v19, %v113_v18  ;;  %v212_v26 = vld [vmem:[%s368_s4] ss:$0 sm:$0xff] }
   0x8   :  { %263 = vmatpush3.bf16.msra.mxu0 %v262_v11 }
   0x9   :  { %269 = vmatpush3.bf16.msra.mxu1 %v268_v13 }
   0xa   :  { %270 = vmatprep.subr.bf16.mxu1 %v283_v0 }
   0xb   :  { %237 = vmatmul.mubr.msk.f32.vlgmr.msra.gmra.mrb[0].mxu0 %vm32_vm1, %v20_v16 }
   0xd   :  { %272 = vmatpush3.bf16.msra.mxu1 %v271_v17 }
   0xe   :  { %273 = vmatprep.subr.bf16.mxu1 %v283_v0 }
  0x11   :  { %275 = vmatpush3.bf16.msra.mxu1 %v274_v20 }
  0xde   :  { %v102_v22 = vpop.f32.mrb[0].mxu0 }
  0xdf   :  { %v103_v23 = vadd.f32 %v210_v21, %v102_v22  ;;  %v238_v24 = vpop.f32.mrb[1].mxu0 }
  0xe1   :  { %v106_v25 = vmax.f32 %v103_v23, 0.0 }
  0xe3   :  { %256 = vmatmul.mubr.msk.f32.vlgmr.msra.gmra.mrb[0].mxu1 %vm122_vm2, %v106_v25 }
 0x1b6   :  { %v192_v27 = vpop.f32.mrb[0].mxu1 }
 0x1b7   :  { %v193_v28 = vadd.f32 %v212_v26, %v192_v27  ;;  %v257_v29 = vpop.f32.mrb[1].mxu1 }
 0x1b9   :  { %196 = vmax.xlane.f32.xlu0 %v193_v28 }
 0x246   :  { %v197_v30 = vpop.xlane.xlu0 %196 }
 0x247   :  { %v198_v31 = vsub.f32 %v193_v28, %v197_v30 }
 0x249   :  { %v199_v32 = vmul.f32 1.442695, %v198_v31 }
 0x24b   :  { %279 = vpow2.f32 %v199_v32 }
 0x255   :  { %v280_v33 = vpop.eup %279 }
 0x256   :  { %201 = vadd.xlane.f32.xlu0 %v280_v33 }
 0x2e3   :  { %v202_v34 = vpop.xlane.xlu0 %201 }
 0x2e4   :  { %281 = vrcp.f32 %v202_v34 }
 0x2ee   :  { %v282_v35 = vpop.eup %281 }
 0x2ef   :  { %v204_v36 = vmul.f32 %v282_v35, %v280_v33 }
 0x2f1   :  { %205 = vst [vmem:[%s369_s5] sm:$0xff] %v204_v36 }

</bundles_post_ra>
